<compile_context>
chip_gen: v7x
topology: tpu7x:2x2x1
jax: 0.10.0
libtpu: 0.0.40
codegen_flags: <defaults>
</compile_context>

<pallas_src>
import jax
import jax.numpy as jnp
import numpy as np
from jax.experimental import pallas as pl
from jax.experimental.pallas import tpu as pltpu

CIN, COUT, K, STRIDE, PAD = 305, 187, 2, 3, 1
NP_PACKED = 768  # round_up(K*K*COUT = 748, 128)


def _round_up(v, m):
    return (v + m - 1) // m * m


# ---------------------------------------------------------------------------
# Weight packing: done ONCE at model-build time (not in the per-call hot path).
# Stacks the per-tap (Cin, Cout) matrices along the output axis, zero-pads the
# output axis to a lane-dense 768 (multiple of 128) and casts to bf16 for the
# MXU.  The contraction dim stays at 305 (no padded x copy is ever made).
# ---------------------------------------------------------------------------
def pack_weight(weight):
    """weight: (CIN, COUT, K, K) float32 (PyTorch ConvTranspose2d layout)."""
    w_all = jnp.concatenate(
        [weight[:, :, kh, kw] for kh in range(K) for kw in range(K)], axis=1)
    w = jnp.zeros((CIN, NP_PACKED), jnp.float32).at[:, :K * K * COUT].set(w_all)
    return w.astype(jnp.bfloat16)                     # (305, 768) bf16


# ---------------------------------------------------------------------------
# Fused Pallas kernel: per-tap matmul (bf16 in, f32 acc) + activation epilogue.
#   g = x_tile @ w_packed
#   out = min( max(g, -1.5*g)/6 + 0.5 , 1 )
# (lower clip at 0 is redundant since max(g,-1.5g) >= 0 -> value >= 0.5)
# ---------------------------------------------------------------------------
def _fused_convt_act_kernel(x_ref, w_ref, o_ref):
    g = jnp.dot(x_ref[...], w_ref[...], preferred_element_type=jnp.float32)
    a = jnp.maximum(g, g * -1.5)
    o_ref[...] = jnp.minimum(a * (1.0 / 6.0) + 0.5, 1.0)


def _fused_matmul_act(x_mat, w_packed):
    """x_mat: (M, 305) bf16.  w_packed: (305, 768) bf16.  Returns (Mp, 768) f32."""
    M, Kd = x_mat.shape
    Kw, Np = w_packed.shape
    # Adaptive tile: cap at 512 rows; guarantee >=2 grid steps when M allows so
    # the "parallel" axis shards across both v7x TensorCores.  Multiple of 16
    # keeps bf16 sublane packing happy.  VMEM @ tm=512 is ~4.5 MiB (safe on
    # v5e's 16 MiB scoped default too).
    tm = max(16, min(512, _round_up(pl.cdiv(M, 2), 16)))
    Mp = _round_up(M, tm)
    x_p = x_mat if Mp == M else jnp.pad(x_mat, ((0, Mp - M), (0, 0)))
    out = pl.pallas_call(
        _fused_convt_act_kernel,
        out_shape=jax.ShapeDtypeStruct((Mp, Np), jnp.float32),
        grid=(Mp // tm,),
        in_specs=[pl.BlockSpec((tm, Kd), lambda i: (i, 0)),   # x tile (pipelined)
                  pl.BlockSpec((Kw, Np), lambda i: (0, 0))],  # weights resident
        out_specs=pl.BlockSpec((tm, Np), lambda i: (i, 0)),   # lane-dense (768)
        compiler_params=pltpu.CompilerParams(
            dimension_semantics=("parallel",)),
    )(x_p, w_packed)
    return out


# ---------------------------------------------------------------------------
# Full forward pass (jit this; takes the pre-packed bf16 weight).
# ---------------------------------------------------------------------------
def model_forward(x_nchw, w_packed):
    """x_nchw: (N, CIN, H, W) f32.  w_packed: (305, 768) bf16 from pack_weight()."""
    N, _, H, W = x_nchw.shape
    M = N * H * W
    # NCHW -> (M, Cin); the bf16 cast fuses into this (mandatory) relayout.
    x_mat = jnp.transpose(x_nchw, (0, 2, 3, 1)).reshape(M, CIN).astype(jnp.bfloat16)

    # One fused Pallas call: matmul + activation epilogue.
    y = _fused_matmul_act(x_mat, w_packed)            # (Mp, 768) f32, activated
    # Crop folded directly into the reshape (no separate materialized copy).
    y = y[:M, :K * K * COUT].reshape(N, H, W, K, K, COUT)

    # Untouched transposed-conv grid positions have g1 = 0 -> activation = 0.5.
    # Pad taps (2x2) up to a full (3x3) stride cell with that constant, then a
    # transpose+reshape lays out the full (uncropped) output grid — no scatter.
    y = jnp.pad(y, ((0, 0), (0, 0), (0, 0),
                    (0, STRIDE - K), (0, STRIDE - K), (0, 0)),
                constant_values=0.5)                  # (N, H, W, 3, 3, C)
    y = jnp.transpose(y, (0, 1, 3, 2, 4, 5))          # (N, H, 3, W, 3, C)
    full = y.reshape(N, H * STRIDE, W * STRIDE, COUT)

    # padding=1 crop of the (Hf, Wf) = ((H-1)*3+2, (W-1)*3+2) valid grid.
    Hf, Wf = (H - 1) * STRIDE + K, (W - 1) * STRIDE + K
    out = full[:, PAD:Hf - PAD, PAD:Wf - PAD, :]
    # Spec output is NCHW; keep the final relayout to match the PyTorch module.
    return jnp.transpose(out, (0, 3, 1, 2))


# ---------------------------------------------------------------------------
# Plain-JAX reference with the ORIGINAL (unsimplified) activation math and
# full f32 precision, to verify both the conv-transpose decomposition and the
# algebraic epilogue (tolerance loosened for the bf16 MXU inputs).
# ---------------------------------------------------------------------------
def reference_forward(x_nchw, weight):
    N, _, H, W = x_nchw.shape
    Hf, Wf = (H - 1) * STRIDE + K, (W - 1) * STRIDE + K
    g1_full = jnp.zeros((N, COUT, Hf, Wf), jnp.float32)
    for kh in range(K):
        for kw in range(K):
            contrib = jnp.einsum('nchw,cd->ndhw', x_nchw, weight[:, :, kh, kw])
            g1_full = g1_full.at[:, :, kh::STRIDE, kw::STRIDE].add(contrib)
    g1 = g1_full[:, :, PAD:Hf - PAD, PAD:Wf - PAD]
    g4 = jnp.where(g1 > 0, g1, g1 * -1.5)
    r = jnp.maximum(g4, 0.0)                          # relu
    e = jnp.where(r > 0, r, jnp.expm1(r))             # elu (alpha = 1)
    return jnp.clip(e / 6.0 + 0.5, 0.0, 1.0)          # hardsigmoid


if __name__ == "__main__":
    key = jax.random.PRNGKey(0)
    kx, kw = jax.random.split(key)

    # Small spatial / batch; channel sizes fixed by the module definition.
    x = jax.random.normal(kx, (2, CIN, 8, 8), dtype=jnp.float32)
    weight = jax.random.normal(kw, (CIN, COUT, K, K), dtype=jnp.float32) * 0.05

    w_packed = jax.block_until_ready(pack_weight(weight))   # once, outside jit

    fwd = jax.jit(model_forward)
    out = jax.block_until_ready(fwd(x, w_packed))
    ref = jax.block_until_ready(reference_forward(x, weight))

    assert out.shape == (2, COUT, 21, 21), out.shape
    # bf16 MXU inputs (f32 accumulation): loosened vs the pure-f32 reference.
    np.testing.assert_allclose(np.asarray(out), np.asarray(ref),
                               rtol=1e-2, atol=1e-2)
    print("KERNEL_OK")
</pallas_src>

<mosaic_0001>
module attributes {stable_mosaic.version = 11 : i64} {
  func.func @_fused_convt_act_kernel(%arg0: i32, %arg1: memref<64x305xbf16, #tpu.memory_space<vmem>>, %arg2: memref<305x768xbf16, #tpu.memory_space<vmem>>, %arg3: memref<64x768xf32, #tpu.memory_space<vmem>>) attributes {dimension_semantics = [#tpu.dimension_semantics<parallel>], iteration_bounds = array<i64: 2>, scalar_prefetch = 0 : i64, scratch_operands = 0 : i64, tpu.core_type = #tpu.core_type<tc>, window_params = [{transform_indices = @transform_0, window_bounds = array<i64: 64, 305>}, {pipeline_mode = #tpu.pipeline_mode<synchronous>, transform_indices = @transform_1, window_bounds = array<i64: 305, 768>}, {transform_indices = @transform_2, window_bounds = array<i64: 64, 768>}]} {
    %c0 = arith.constant 0 : index
    %c0_0 = arith.constant 0 : index
    %0 = vector.load %arg1[%c0, %c0_0] : memref<64x305xbf16, #tpu.memory_space<vmem>>, vector<64x305xbf16>
    %c0_1 = arith.constant 0 : index
    %c0_2 = arith.constant 0 : index
    %1 = vector.load %arg2[%c0_1, %c0_2] : memref<305x768xbf16, #tpu.memory_space<vmem>>, vector<305x768xbf16>
    %cst = arith.constant dense<0.000000e+00> : vector<64x768xf32>
    %2 = tpu.matmul %0, %1, %cst {dimension_numbers = #tpu.dot_dimension_numbers<[1], [0], [0], [1], [0, 0, 1, 1], [], []>} : vector<64x305xbf16>, vector<305x768xbf16>, vector<64x768xf32> -> vector<64x768xf32>
    %cst_3 = arith.constant -1.500000e+00 : f32
    %3 = vector.broadcast %cst_3 : f32 to vector<64x768xf32>
    %4 = arith.mulf %2, %3 : vector<64x768xf32>
    %5 = arith.maximumf %2, %4 : vector<64x768xf32>
    %cst_4 = arith.constant 0.166666672 : f32
    %6 = vector.broadcast %cst_4 : f32 to vector<64x768xf32>
    %7 = arith.mulf %5, %6 : vector<64x768xf32>
    %cst_5 = arith.constant 5.000000e-01 : f32
    %8 = vector.broadcast %cst_5 : f32 to vector<64x768xf32>
    %9 = arith.addf %7, %8 : vector<64x768xf32>
    %cst_6 = arith.constant 1.000000e+00 : f32
    %10 = vector.broadcast %cst_6 : f32 to vector<64x768xf32>
    %11 = arith.minimumf %9, %10 : vector<64x768xf32>
    %c0_7 = arith.constant 0 : index
    %c0_8 = arith.constant 0 : index
    %12 = vector.load %arg3[%c0_7, %c0_8] : memref<64x768xf32, #tpu.memory_space<vmem>>, vector<64x768xf32>
    tpu.vector_store %arg3[%c0_7, %c0_8], %11 {strides = array<i32>} : memref<64x768xf32, #tpu.memory_space<vmem>>, vector<64x768xf32>,
    return
  }
  func.func @transform_0(%arg0: i32) -> (i32, i32) {
    %c0_i32 = arith.constant 0 : i32
    %c0_i32_0 = arith.constant 0 : i32
    return %arg0, %c0_i32 : i32, i32
  }
  func.func @transform_1(%arg0: i32) -> (i32, i32) {
    %c0_i32 = arith.constant 0 : i32
    %c0_i32_0 = arith.constant 0 : i32
    %c0_i32_1 = arith.constant 0 : i32
    return %c0_i32, %c0_i32_0 : i32, i32
  }
  func.func @transform_2(%arg0: i32) -> (i32, i32) {
    %c0_i32 = arith.constant 0 : i32
    %c0_i32_0 = arith.constant 0 : i32
    return %arg0, %c0_i32 : i32, i32
  }
}

</mosaic_0001>

<bundles_post_ra>
// kernel: model_forward.1
= control target key start
LH: loop header
LB: loop body
LE: loop exit
PB: predicated region body
PF: predicated region fallthrough
CT: control target
= control target key end

     0   :  { %7 = vsyncpa [#allocation3], 0  ;;  %s2265_s9 = smov 0   ;;  %s2569_s0 = inlined_call_operand.vmem [shape: bf16[128,305], index: 0, kind: input, shape index: {}]   ;;  %s2570_s1 = inlined_call_operand.hbm [shape: bf16[305,768], index: 1, kind: input, shape index: {}]   ;;  %s2571_s2 = inlined_call_operand.vmem [shape: f32[128,768], index: 2, kind: output, shape index: {}]  }
   0x1 LB: > { %s1776_s10 = sadd.s32 4294967295, %s2244_s9   ;;  %p1778_p0 = scmp.ge.s32.totalorder %s2244_s9, 1  ;;  %s2244_s9 = sphi %s2265_s9, %s13_s9  }
   0x2   : > { %p91_p1 = scmp.lt.s32.totalorder %s2244_s9, 3  ;;  %s2246_s11 = smov [#allocation2]  }
   0x3   : > { %s103_s12 = sshll.u32 %s2246_s11, 4  ;;  %p2279_p3 = scmp.eq.s32.totalorder %s1776_s10, 0  ;;  %s104_s12 = int_to_ptr.vmem [resolvable:$true] %s103_s12 }
   0x4   : > { %p2273_p2 = pnand %p1778_p0, %p91_p1  ;;  %s2206_s18 = scalar_lea.hbm %s2570_s1, 14976 }
   0x5   : > { %s2576_s14 = scalar_select %p2279_p3, 1, 0 }
   0x6   : > { %s2575_s13 = scalar_select %p2273_p2, 1, 0 }
   0x7   : > { %p1995_p4 = pneg %p2273_p2  ;;  %p2207_p6 = scmp.ne.s32.totalorder %s2570_s1, %s2206_s18 }
   0x8   : > { %p2213_p10 = scmp.lt.u32.totalorder %s2206_s18, %s2570_s1 }
   0x9   : > { %p2287_p5 = pnand %p2279_p3, %p1995_p4 }
   0xb   : > { %p2208_p7 = pneg %p2287_p5 }
   0xd   : > { %p2209_p8 = pnand %p2208_p7, %p2207_p6 }
   0xf   : > { %p2210_p9 = pneg %p2209_p8 }
  0x11   : > { %p2215_p11 = pnand %p2213_p10, %p2210_p9 }
  0x13   : > { %2218 = shalt.err (!%p2215_p11)
}
  0x14   : > { %s2219_s23 = scalar_lea.vmem %s104_s12, 14976  ;;  %p2227_p1 = scmp.lt.s32.totalorder %s104_s12, %s104_s12 }
  0x15   : > { %p2220_p12 = scmp.ne.s32.totalorder %s104_s12, %s2219_s23  ;;  %p2228_p4 = scmp.lt.s32.totalorder %s2219_s23, %s2219_s23 }
  0x17   : > { %p2222_p13 = pnand %p2220_p12, %p2208_p7  ;;  %p2229_p3 = por %p2228_p4, %p2227_p1 }
  0x19   : > { %p2223_p0 = pneg %p2222_p13 }
  0x1b   : > { %p2230_p2 = pnand %p2229_p3, %p2223_p0 }
  0x1d   : > { %2233 = shalt.err (!%p2230_p2)
}
  0x1e   : > { %s2247_s24 = smov 384   ;;  %s2248_s25 = smov 24  }
  0x1f   : > { %1998 = dma.hbm_to_vmem [thread:$0]  (!%p2287_p5), %s2570_s1, 14976, %s104_s12, [#allocation3], %s2247_s24, %s2247_s24, %s2248_s25  }
  0x20   : > { %p2578_p6 = scmp.ne.s32.totalorder %s2575_s13, 0 }
  0x21   : > { %p2579_p8 = scmp.ne.s32.totalorder (!%p2578_p6), %s2576_s14, 0 }
  0x22   : > { %129 = sbr.rel (%p2578_p6) target bundleno = 442 (0x1ba), region = 28 }
  0x29   : > { %2239 = dma.done.wait (%p2579_p8), [#allocation3], 14976  }
  0x2a   : > { %2241 = vsyncadd (%p2579_p8), [#allocation3], 4294952320  ;;  %v2249_v0 = vmov 0   ;;  %s1783_s28 = sshll.u32 %s1776_s10, 3  ;;  %v2013_v1 = vld [vmem:[#allocation2 + $0x4] ss:$24 sps:$4 sm:$0xff]  }
  0x2b   : > { %1085 = vmatprep.mubr.bf16.mxu0 %v2249_v0  ;;  %p154_p2 = scmp.lt.s32.totalorder %s1783_s28, 15  ;;  %v2015_v2 = vld [vmem:[#allocation2 + $0x304] ss:$24 sps:$4 sm:$0xff]   ;;  %980 = vmatprep.subr.bf16.mxu1 %v2013_v1  ;;  %v2017_v3 = vld [vmem:[#allocation2] ss:$24 sps:$4 sm:$0xff]   ;;  %vm959_vm0 = vcmask 1040384  }
  0x2c   : > { %v2018_v4 = vld [vmem:[#allocation2 + $0x300] ss:$24 sps:$4 sm:$0xff]   ;;  %1053 = vmatprep.subr.bf16.mxu0 %v2015_v2  ;;  %v2019_v5 = vld [vmem:[#allocation2 + $0x34] ss:$24 sps:$4 sm:$0xff]   ;;  %981 = vmatpush1.bf16.msra.mxu1 %v2017_v3  ;;  %v2023_v7 = vld [vmem:[#allocation2 + $0x30] ss:$24 sps:$4 sm:$0xff]  }
  0x2d   : > { %s2581_s28 = smov (!%p154_p2, %s1783_s28), 15  ;;  %1054 = vmatpush1.bf16.msra.mxu0 %v2018_v4  ;;  %v2021_v6 = vld [vmem:[#allocation2 + $0x334] ss:$24 sps:$4 sm:$0xff]   ;;  %982 = vmatprep.subr.bf16.mxu1 %v2019_v5  ;;  %v2024_v8 = vld [vmem:[#allocation2 + $0x330] ss:$24 sps:$4 sm:$0xff]   ;;  %v2320_v15 = vsel %vm959_vm0, 65535, %v2249_v0 }
  0x2e   : > { %s1989_s29 = smul.u32 12, %s2581_s28  ;;  %1055 = vmatprep.subr.bf16.mxu0 %v2021_v6  ;;  %v2025_v9 = vld [vmem:[#allocation2 + $0x64] ss:$24 sps:$4 sm:$0xff]   ;;  %v2029_v11 = vld [vmem:[#allocation2 + $0x60] ss:$24 sps:$4 sm:$0xff]   ;;  %vm946_vm1 = vcmask 400384  }
  0x2f   : > { %v2027_v10 = vld [vmem:[#allocation2 + $0x364] ss:$24 sps:$4 sm:$0xff]   ;;  %v2030_v12 = vld [vmem:[#allocation2 + $0x360] ss:$24 sps:$4 sm:$0xff]   ;;  %v2031_v13 = vld [vmem:[#allocation2 + $0x94] ss:$24 sps:$4 sm:$0xff]  }
  0x30   : > { %983 = vmatpush1.bf16.msra.mxu1 %v2023_v7  ;;  %v298_v14 = vld [vmem:[#allocation2 + $0x390] sm:$0x11]  ;;  %s2325_s4 = scalar_lea.vmem %s2569_s0, %s1989_s29  ;;  %v2036_v21 = vld [vmem:[#allocation2 + $0xc4] ss:$24 sps:$4 sm:$0xff]   ;;  %v2039_v24 = vld [vmem:[#allocation2 + $0xc0] ss:$24 sps:$4 sm:$0xff]  }
  0x31   : > { %1056 = vmatpush1.bf16.msra.mxu0 %v2024_v8  ;;  %984 = vmatprep.subr.bf16.mxu1 %v2025_v9  ;;  %v1914_v16 = vcombine.high %v298_v14, %v298_v14  ;;  %v1913_v17 = vcombine.low %v298_v14, %v298_v14  ;;  %v2034_v18 = vld [vmem:[#allocation2 + $0x90] ss:$24 sps:$4 sm:$0xff]   ;;  %v2042_v22 = vld [vmem:[#allocation2 + $0x30c] ss:$24 sps:$4 sm:$0xff]   ;;  %v2052_v27 = vld [vmem:[#allocation2 + $0x33c] ss:$24 sps:$4 sm:$0xff]  }
  0x32   : > { %1057 = vmatprep.subr.bf16.mxu0 %v2027_v10  ;;  %v2330_v23 = vld [vmem:[%s2325_s4 + $0x8] ss:$12 sps:$4 sm:$0xff]   ;;  %v2050_v29 = vld [vmem:[#allocation2 + $0x338] ss:$24 sps:$4 sm:$0xff]   ;;  %v2046_v30 = vld [vmem:[#allocation2 + $0x124] ss:$24 sps:$4 sm:$0xff]  }
  0x33   : > { %v966_v19 = vand.u32 %v1914_v16, %v2320_v15  ;;  %v963_v20 = vand.u32 %v1913_v17, %v2320_v15  ;;  %v2040_v25 = vld [vmem:[#allocation2 + $0x308] ss:$24 sps:$4 sm:$0xff]   ;;  %v2043_v26 = vld [vmem:[#allocation2 + $0xf4] ss:$24 sps:$4 sm:$0xff]   ;;  %v299_v36 = vld [vmem:[#allocation2 + $0x398] sm:$0x11] }
  0x34   : > { %985 = vmatpush1.bf16.msra.mxu1 %v2029_v11  ;;  %v2045_v28 = vld [vmem:[#allocation2 + $0xf0] ss:$24 sps:$4 sm:$0xff]   ;;  %v2336_v31 = vld [vmem:[%s2325_s4 + $0x20] ss:$12 sps:$4 sm:$0xff]   ;;  %v1915_v38 = vcombine.low %v299_v36, %v299_v36  ;;  %v1916_v39 = vcombine.high %v299_v36, %v299_v36  ;;  %v2056_v40 = vld [vmem:[#allocation2 + $0x184] ss:$24 sps:$4 sm:$0xff]  }
  0x35   : > { %1058 = vmatpush1.bf16.msra.mxu0 %v2030_v12  ;;  %986 = vmatprep.subr.bf16.mxu1 %v2031_v13  ;;  %v2062_v32 = vld [vmem:[#allocation2 + $0x36c] ss:$24 sps:$4 sm:$0xff]   ;;  %v2049_v33 = vld [vmem:[#allocation2 + $0x120] ss:$24 sps:$4 sm:$0xff]   ;;  %v2055_v37 = vld [vmem:[#allocation2 + $0x150] ss:$24 sps:$4 sm:$0xff]  }
  0x36   : > { %1059 = vmatprep.subr.bf16.mxu0 %v966_v19  ;;  %v2053_v34 = vld [vmem:[#allocation2 + $0x154] ss:$24 sps:$4 sm:$0xff]   ;;  %v2060_v35 = vld [vmem:[#allocation2 + $0x368] ss:$24 sps:$4 sm:$0xff]   ;;  %v972_v41 = vand.u32 %v1916_v39, %v2320_v15  ;;  %v969_v42 = vand.u32 %v1915_v38, %v2320_v15  ;;  %v2344_v44 = vld [vmem:[%s2325_s4 + $0x38] ss:$12 sps:$4 sm:$0xff]  }
  0x37   : > { %v2077_v43 = vld [vmem:[#allocation2 + $0x14] ss:$24 sps:$4 sm:$0xff]   ;;  %v2059_v45 = vld [vmem:[#allocation2 + $0x180] ss:$24 sps:$4 sm:$0xff]   ;;  %v2065_v47 = vld [vmem:[#allocation2 + $0x1b0] ss:$24 sps:$4 sm:$0xff]  }
  0x38   : > { %987 = vmatpush1.bf16.msra.mxu1 %v2034_v18  ;;  %v2063_v46 = vld [vmem:[#allocation2 + $0x1b4] ss:$24 sps:$4 sm:$0xff]   ;;  %v2066_v48 = vld [vmem:[#allocation2 + $0x1e4] ss:$24 sps:$4 sm:$0xff]   ;;  %v2069_v50 = vld [vmem:[#allocation2 + $0x1e0] ss:$24 sps:$4 sm:$0xff]  }
  0x39   : > { %1060 = vmatpush1.bf16.msra.mxu0 %v963_v20  ;;  %988 = vmatprep.subr.bf16.mxu1 %v2036_v21  ;;  %v2350_v49 = vld [vmem:[%s2325_s4 + $0x50] ss:$12 sps:$4 sm:$0xff]   ;;  %v2072_v52 = vld [vmem:[#allocation2 + $0x214] ss:$24 sps:$4 sm:$0xff]   ;;  %v2080_v56 = vld [vmem:[#allocation2 + $0x240] ss:$24 sps:$4 sm:$0xff]  }
  0x3a   : > { %1199 = vmatprep.subr.bf16.mxu0 %v2042_v22  ;;  %v2353_v51 = vld [vmem:[%s2325_s4 + $0x4] ss:$12 sps:$4 sm:$0xff]   ;;  %v2084_v58 = vld [vmem:[#allocation2 + $0x274] ss:$24 sps:$4 sm:$0xff]   ;;  %v2081_v59 = vld [vmem:[#allocation2 + $0x40] ss:$24 sps:$4 sm:$0xff]  }
  0x3b   : > { %1012 = vmatprep.mubr.bf16.mxu1 %v2353_v51  ;;  %v2074_v53 = vld [vmem:[#allocation2 + $0x210] ss:$24 sps:$4 sm:$0xff]   ;;  %v2078_v54 = vld [vmem:[#allocation2 + $0x244] ss:$24 sps:$4 sm:$0xff]   ;;  %v2089_v61 = vld [vmem:[#allocation2 + $0x74] ss:$24 sps:$4 sm:$0xff]  }
  0x3c   : > { %1919 = vmatmul.mubr.msk.bf16.vlgmr.msra.gmra.mrb[0].mxu0 %vm946_vm1, %v2330_v23  ;;  %989 = vmatpush1.bf16.msra.mxu1 %v2039_v24  ;;  %v2075_v55 = vld [vmem:[#allocation2 + $0x10] ss:$24 sps:$4 sm:$0xff]   ;;  %v2083_v57 = vld [vmem:[#allocation2 + $0x44] ss:$24 sps:$4 sm:$0xff]   ;;  %v2092_v1 = vld [vmem:[#allocation2 + $0x2a0] ss:$24 sps:$4 sm:$0xff]  }
  0x3d   : > { %1200 = vmatpush1.bf16.msra.mxu0 %v2040_v25  ;;  %990 = vmatprep.subr.bf16.mxu1 %v2043_v26  ;;  %v2086_v60 = vld [vmem:[#allocation2 + $0x270] ss:$24 sps:$4 sm:$0xff]   ;;  %v2090_v62 = vld [vmem:[#allocation2 + $0x2a4] ss:$24 sps:$4 sm:$0xff]   ;;  %v2096_v3 = vld [vmem:[#allocation2 + $0x2d4] ss:$24 sps:$4 sm:$0xff]  }
  0x3e   : > { %1095 = vmatprep.mubr.bf16.mxu0 %v2249_v0  ;;  %1201 = vmatprep.subr.bf16.mxu0 %v2052_v27  ;;  %v2087_v63 = vld [vmem:[#allocation2 + $0x70] ss:$24 sps:$4 sm:$0xff]   ;;  %v2095_v2 = vld [vmem:[#allocation2 + $0xa4] ss:$24 sps:$4 sm:$0xff]   ;;  %v2093_v4 = vld [vmem:[#allocation2 + $0xa0] ss:$24 sps:$4 sm:$0xff]  }
  0x3f   : > { %v2098_v5 = vld [vmem:[#allocation2 + $0x2d0] ss:$24 sps:$4 sm:$0xff]   ;;  %v2103_v6 = vld [vmem:[#allocation2 + $0xd4] ss:$24 sps:$4 sm:$0xff]   ;;  %v2110_v11 = vld [vmem:[#allocation2 + $0x104] ss:$24 sps:$4 sm:$0xff]  }
  0x40   : > { %991 = vmatpush1.bf16.msra.mxu1 %v2045_v28  ;;  %v2107_v7 = vld [vmem:[#allocation2 + $0xc] ss:$24 sps:$4 sm:$0xff]   ;;  %v2101_v9 = vld [vmem:[#allocation2 + $0xd0] ss:$24 sps:$4 sm:$0xff]   ;;  %v2113_v12 = vld [vmem:[#allocation2 + $0x3c] ss:$24 sps:$4 sm:$0xff]  }
  0x41   : > { %1202 = vmatpush1.bf16.msra.mxu0 %v2050_v29  ;;  %992 = vmatprep.subr.bf16.mxu1 %v2046_v30  ;;  %v2366_v8 = vld [vmem:[%s2325_s4] ss:$12 sps:$4 sm:$0xff]   ;;  %v2369_v13 = vld [vmem:[%s2325_s4 + $0x1c] ss:$12 sps:$4 sm:$0xff]   ;;  %v2111_v16 = vld [vmem:[#allocation2 + $0x38] ss:$24 sps:$4 sm:$0xff]  }
  0x42   : > { %1203 = vmatprep.subr.bf16.mxu0 %v2062_v32  ;;  %v2105_v10 = vld [vmem:[#allocation2 + $0x8] ss:$24 sps:$4 sm:$0xff]   ;;  %v2118_v17 = vld [vmem:[#allocation2 + $0x134] ss:$24 sps:$4 sm:$0xff]   ;;  %v2377_v19 = vld [vmem:[%s2325_s4 + $0x18] ss:$12 sps:$4 sm:$0xff]  }
  0x43   : > { %v2108_v14 = vld [vmem:[#allocation2 + $0x100] ss:$24 sps:$4 sm:$0xff]   ;;  %v2122_v18 = vld [vmem:[#allocation2 + $0x6c] ss:$24 sps:$4 sm:$0xff]   ;;  %v2116_v20 = vld [vmem:[#allocation2 + $0x130] ss:$24 sps:$4 sm:$0xff]  }
  0x44   : > { %1920 = vmatmul.mubr.msk.bf16.gmra.mrb[4].mxu0 %vm946_vm1, %v2336_v31  ;;  %993 = vmatpush1.bf16.msra.mxu1 %v2049_v33  ;;  %v2120_v21 = vld [vmem:[#allocation2 + $0x68] ss:$24 sps:$4 sm:$0xff]   ;;  %v2125_v22 = vld [vmem:[#allocation2 + $0x164] ss:$24 sps:$4 sm:$0xff]   ;;  %v2126_v27 = vld [vmem:[#allocation2 + $0x98] ss:$24 sps:$4 sm:$0xff]  }
  0x45   : > { %1105 = vmatprep.mubr.bf16.mxu0 %v2249_v0  ;;  %994 = vmatprep.subr.bf16.mxu1 %v2053_v34  ;;  %v2128_v24 = vld [vmem:[#allocation2 + $0x9c] ss:$24 sps:$4 sm:$0xff]   ;;  %v2123_v26 = vld [vmem:[#allocation2 + $0x160] ss:$24 sps:$4 sm:$0xff]   ;;  %v2137_v29 = vld [vmem:[#allocation2 + $0xcc] ss:$24 sps:$4 sm:$0xff]  }
  0x46   : > { %1204 = vmatpush1.bf16.msra.mxu0 %v2060_v35  ;;  %v2380_v25 = vld [vmem:[%s2325_s4 + $0x34] ss:$12 sps:$4 sm:$0xff]   ;;  %v2388_v30 = vld [vmem:[%s2325_s4 + $0x30] ss:$12 sps:$4 sm:$0xff]   ;;  %v2391_v36 = vld [vmem:[%s2325_s4 + $0x4c] ss:$12 sps:$4 sm:$0xff]  }
  0x47   : > { %1205 = vmatprep.subr.bf16.mxu0 %v972_v41  ;;  %v2133_v28 = vld [vmem:[#allocation2 + $0x194] ss:$24 sps:$4 sm:$0xff]   ;;  %v2131_v32 = vld [vmem:[#allocation2 + $0x190] ss:$24 sps:$4 sm:$0xff]   ;;  %v2140_v34 = vld [vmem:[#allocation2 + $0x1c4] ss:$24 sps:$4 sm:$0xff]  }
  0x48   : > { %995 = vmatpush1.bf16.msra.mxu1 %v2055_v37  ;;  %v2135_v33 = vld [vmem:[#allocation2 + $0xc8] ss:$24 sps:$4 sm:$0xff]   ;;  %v2143_v35 = vld [vmem:[#allocation2 + $0xfc] ss:$24 sps:$4 sm:$0xff]   ;;  %v2141_v38 = vld [vmem:[#allocation2 + $0xf8] ss:$24 sps:$4 sm:$0xff]  }
  0x49   : > { %996 = vmatprep.subr.bf16.mxu1 %v2056_v40  ;;  %v2138_v37 = vld [vmem:[#allocation2 + $0x1c0] ss:$24 sps:$4 sm:$0xff]   ;;  %v2148_v39 = vld [vmem:[#allocation2 + $0x1f4] ss:$24 sps:$4 sm:$0xff]   ;;  %s1990_s5 = smul.u32 48, %s2581_s28 }
  0x4a   : > { %1206 = vmatpush1.bf16.msra.mxu0 %v969_v42  ;;  %v2152_v40 = vld [vmem:[#allocation2 + $0x12c] ss:$24 sps:$4 sm:$0xff]   ;;  %v2396_v41 = vld [vmem:[%s2325_s4 + $0x48] ss:$12 sps:$4 sm:$0xff]  }
  0x4b   : > { %1272 = vmatprep.subr.bf16.mxu0 %v2077_v43  ;;  %v2146_v42 = vld [vmem:[#allocation2 + $0x1f0] ss:$24 sps:$4 sm:$0xff]   ;;  %s2476_s8 = scalar_lea.vmem %s2571_s2, %s1990_s5 }
  0x4c   : > { %1921 = vmatmul.mubr.msk.bf16.gmra.mrb[8].mxu0 %vm946_vm1, %v2344_v44  ;;  %997 = vmatpush1.bf16.msra.mxu1 %v2059_v45  ;;  %v2150_v43 = vld [vmem:[#allocation2 + $0x128] ss:$24 sps:$4 sm:$0xff]   ;;  %v2155_v45 = vld [vmem:[#allocation2 + $0x224] ss:$24 sps:$4 sm:$0xff]  }
  0x4d   : > { %1115 = vmatprep.mubr.bf16.mxu0 %v2249_v0  ;;  %998 = vmatprep.subr.bf16.mxu1 %v2063_v46  ;;  %v2158_v46 = vld [vmem:[#allocation2 + $0x15c] ss:$24 sps:$4 sm:$0xff]  }
  0x50   : > { %999 = vmatpush1.bf16.msra.mxu1 %v2065_v47  ;;  %v2153_v47 = vld [vmem:[#allocation2 + $0x220] ss:$24 sps:$4 sm:$0xff]  }
  0x51   : > { %1000 = vmatprep.subr.bf16.mxu1 %v2066_v48  ;;  %v2156_v48 = vld [vmem:[#allocation2 + $0x158] ss:$24 sps:$4 sm:$0xff]  }
  0x54   : > { %1922 = vmatmul.mubr.msk.bf16.gmra.mrb[12].mxu0 %vm946_vm1, %v2350_v49  ;;  %1001 = vmatpush1.bf16.msra.mxu1 %v2069_v50  ;;  %v2161_v50 = vld [vmem:[#allocation2 + $0x254] ss:$24 sps:$4 sm:$0xff]  }
  0x55   : > { %1231 = vmatprep.mubr.bf16.mxu0 %v2249_v0  ;;  %1002 = vmatprep.subr.bf16.mxu1 %v2072_v52  ;;  %v2164_v52 = vld [vmem:[#allocation2 + $0x18c] ss:$24 sps:$4 sm:$0xff]  }
  0x58   : > { %1003 = vmatpush1.bf16.msra.mxu1 %v2074_v53  ;;  %v2159_v53 = vld [vmem:[#allocation2 + $0x250] ss:$24 sps:$4 sm:$0xff]  }
  0x59   : > { %1004 = vmatprep.subr.bf16.mxu1 %v2078_v54  ;;  %v2162_v54 = vld [vmem:[#allocation2 + $0x188] ss:$24 sps:$4 sm:$0xff]  }
  0x5c   : > { %1923 = vmatmul.mubr.msk.bf16.vlgmr.msra.gmra.mrb[16].mxu0 %vm946_vm1, %v2330_v23  ;;  %1005 = vmatpush1.bf16.msra.mxu1 %v2080_v56  ;;  %v2170_v56 = vld [vmem:[#allocation2 + $0x1bc] ss:$24 sps:$4 sm:$0xff]  }
  0x5d   : > { %1273 = vmatpush1.bf16.msra.mxu0 %v2075_v55  ;;  %1006 = vmatprep.subr.bf16.mxu1 %v2084_v58  ;;  %v2167_v55 = vld [vmem:[#allocation2 + $0x284] ss:$24 sps:$4 sm:$0xff]   ;;  %v2168_v58 = vld [vmem:[#allocation2 + $0x1b8] ss:$24 sps:$4 sm:$0xff]  }
  0x5e   : > { %1274 = vmatprep.subr.bf16.mxu0 %v2083_v57  ;;  %1241 = vmatprep.mubr.bf16.mxu0 %v2249_v0  ;;  %v2165_v57 = vld [vmem:[#allocation2 + $0x280] ss:$24 sps:$4 sm:$0xff]  }
  0x60   : > { %1007 = vmatpush1.bf16.msra.mxu1 %v2086_v60  ;;  %v2176_v60 = vld [vmem:[#allocation2 + $0x1ec] ss:$24 sps:$4 sm:$0xff]  }
  0x61   : > { %1275 = vmatpush1.bf16.msra.mxu0 %v2081_v59  ;;  %1008 = vmatprep.subr.bf16.mxu1 %v2090_v62  ;;  %v2173_v59 = vld [vmem:[#allocation2 + $0x2b4] ss:$24 sps:$4 sm:$0xff]   ;;  %v2179_v62 = vld [vmem:[#allocation2 + $0x2e4] ss:$24 sps:$4 sm:$0xff]  }
  0x62   : > { %1276 = vmatprep.subr.bf16.mxu0 %v2089_v61  ;;  %v2171_v61 = vld [vmem:[#allocation2 + $0x2b0] ss:$24 sps:$4 sm:$0xff]  }
  0x64   : > { %1924 = vmatmul.mubr.msk.bf16.gmra.mrb[20].mxu0 %vm946_vm1, %v2336_v31  ;;  %1009 = vmatpush1.bf16.msra.mxu1 %v2092_v1  ;;  %v2177_v1 = vld [vmem:[#allocation2 + $0x2e0] ss:$24 sps:$4 sm:$0xff]  }
  0x65   : > { %1277 = vmatpush1.bf16.msra.mxu0 %v2087_v63  ;;  %1010 = vmatprep.subr.bf16.mxu1 %v2096_v3  ;;  %v2182_v63 = vld [vmem:[#allocation2 + $0x21c] ss:$24 sps:$4 sm:$0xff]   ;;  %v2185_v3 = vld [vmem:[#allocation2 + $0x24c] ss:$24 sps:$4 sm:$0xff]  }
  0x66   : > { %1278 = vmatprep.subr.bf16.mxu0 %v2095_v2  ;;  %1251 = vmatprep.mubr.bf16.mxu0 %v2249_v0  ;;  %v2180_v2 = vld [vmem:[#allocation2 + $0x218] ss:$24 sps:$4 sm:$0xff]  }
  0x68   : > { %1011 = vmatpush1.bf16.msra.mxu1 %v2098_v5  ;;  %v2183_v5 = vld [vmem:[#allocation2 + $0x248] ss:$24 sps:$4 sm:$0xff]  }
  0x69   : > { %1279 = vmatpush1.bf16.msra.mxu0 %v2093_v4  ;;  %1126 = vmatprep.subr.bf16.mxu1 %v2107_v7  ;;  %v2188_v4 = vld [vmem:[#allocation2 + $0x314] ss:$24 sps:$4 sm:$0xff]  }
  0x6a   : > { %1280 = vmatprep.subr.bf16.mxu0 %v2103_v6  ;;  %v2186_v6 = vld [vmem:[#allocation2 + $0x310] ss:$24 sps:$4 sm:$0xff]   ;;  %v2191_v7 = vld [vmem:[#allocation2 + $0x27c] ss:$24 sps:$4 sm:$0xff]  }
  0x6b   : > { %1013 = vmatmul.mubr.bf16.vlgmr.msra.gmra.mrb[0].mxu1 %v2366_v8 }
  0x6c   : > { %1925 = vmatmul.mubr.msk.bf16.gmra.mrb[24].mxu0 %vm946_vm1, %v2344_v44  ;;  %1127 = vmatpush1.bf16.msra.mxu1 %v2105_v10  ;;  %v300_v10 = vld [vmem:[#allocation2 + $0x3a0] sm:$0x11] }
  0x6d   : > { %1281 = vmatpush1.bf16.msra.mxu0 %v2101_v9  ;;  %1128 = vmatprep.subr.bf16.mxu1 %v2113_v12  ;;  %v2197_v9 = vld [vmem:[#allocation2 + $0x344] ss:$24 sps:$4 sm:$0xff]   ;;  %v2195_v12 = vld [vmem:[#allocation2 + $0x340] ss:$24 sps:$4 sm:$0xff]  }
  0x6e   : > { %1282 = vmatprep.subr.bf16.mxu0 %v2110_v11  ;;  %1022 = vmatprep.mubr.bf16.mxu1 %v2369_v13  ;;  %v2189_v11 = vld [vmem:[#allocation2 + $0x278] ss:$24 sps:$4 sm:$0xff]  }
  0x6f   : > { %1261 = vmatprep.mubr.bf16.mxu0 %v2249_v0 }
  0x70   : > { %1129 = vmatpush1.bf16.msra.mxu1 %v2111_v16  ;;  %v2203_v16 = vld [vmem:[#allocation2 + $0x374] ss:$24 sps:$4 sm:$0xff]  }
  0x71   : > { %1283 = vmatpush1.bf16.msra.mxu0 %v2108_v14  ;;  %1130 = vmatprep.subr.bf16.mxu1 %v2122_v18  ;;  %v2194_v14 = vld [vmem:[#allocation2 + $0x2ac] ss:$24 sps:$4 sm:$0xff]   ;;  %v2192_v18 = vld [vmem:[#allocation2 + $0x2a8] ss:$24 sps:$4 sm:$0xff]  }
  0x72   : > { %1284 = vmatprep.subr.bf16.mxu0 %v2118_v17  ;;  %v1918_v17 = vcombine.high %v300_v10, %v300_v10 }
  0x73   : > { %1023 = vmatmul.mubr.bf16.gmra.mrb[4].mxu1 %v2377_v19 }
  0x74   : > { %1926 = vmatmul.mubr.msk.bf16.gmra.mrb[28].mxu0 %vm946_vm1, %v2350_v49  ;;  %1131 = vmatpush1.bf16.msra.mxu1 %v2120_v21  ;;  %v2201_v21 = vld [vmem:[#allocation2 + $0x370] ss:$24 sps:$4 sm:$0xff]  }
  0x75   : > { %1285 = vmatpush1.bf16.msra.mxu0 %v2116_v20  ;;  %1132 = vmatprep.subr.bf16.mxu1 %v2128_v24  ;;  %v2200_v20 = vld [vmem:[#allocation2 + $0x2dc] ss:$24 sps:$4 sm:$0xff]   ;;  %v978_v24 = vand.u32 %v1918_v17, %v2320_v15 }
  0x76   : > { %1286 = vmatprep.subr.bf16.mxu0 %v2125_v22  ;;  %1032 = vmatprep.mubr.bf16.mxu1 %v2380_v25  ;;  %v1917_v22 = vcombine.low %v300_v10, %v300_v10 }
  0x77   : > { %1304 = vmatprep.mubr.bf16.mxu0 %v2353_v51 }
  0x78   : > { %1133 = vmatpush1.bf16.msra.mxu1 %v2126_v27  ;;  %v975_v27 = vand.u32 %v1917_v22, %v2320_v15 }
  0x79   : > { %1287 = vmatpush1.bf16.msra.mxu0 %v2123_v26  ;;  %1134 = vmatprep.subr.bf16.mxu1 %v2137_v29  ;;  %v2198_v26 = vld [vmem:[#allocation2 + $0x2d8] ss:$24 sps:$4 sm:$0xff]  }
  0x7a   : > { %1288 = vmatprep.subr.bf16.mxu0 %v2133_v28 }
  0x7b   : > { %1033 = vmatmul.mubr.bf16.gmra.mrb[8].mxu1 %v2388_v30 }
  0x7c   : > { %1135 = vmatpush1.bf16.msra.mxu1 %v2135_v33  ;;  %1042 = vmatprep.mubr.bf16.mxu1 %v2391_v36 }
  0x7d   : > { %1289 = vmatpush1.bf16.msra.mxu0 %v2131_v32  ;;  %1136 = vmatprep.subr.bf16.mxu1 %v2143_v35 }
  0x7e   : > { %1290 = vmatprep.subr.bf16.mxu0 %v2140_v34 }
  0x80   : > { %1137 = vmatpush1.bf16.msra.mxu1 %v2141_v38 }
  0x81   : > { %1291 = vmatpush1.bf16.msra.mxu0 %v2138_v37  ;;  %1138 = vmatprep.subr.bf16.mxu1 %v2152_v40 }
  0x82   : > { %1292 = vmatprep.subr.bf16.mxu0 %v2148_v39 }
  0x83   : > { %1043 = vmatmul.mubr.bf16.gmra.mrb[12].mxu1 %v2396_v41 }
  0x84   : > { %1139 = vmatpush1.bf16.msra.mxu1 %v2150_v43  ;;  %1158 = vmatprep.mubr.bf16.mxu1 %v2353_v51  ;;  %v2174_v51 = vld [vmem:[#allocation2 + $0x1e8] ss:$24 sps:$4 sm:$0xff]  }
  0x85   : > { %1293 = vmatpush1.bf16.msra.mxu0 %v2146_v42  ;;  %1140 = vmatprep.subr.bf16.mxu1 %v2158_v46 }
  0x86   : > { %1294 = vmatprep.subr.bf16.mxu0 %v2155_v45 }
  0x88   : > { %1141 = vmatpush1.bf16.msra.mxu1 %v2156_v48 }
  0x89   : > { %1295 = vmatpush1.bf16.msra.mxu0 %v2153_v47  ;;  %1142 = vmatprep.subr.bf16.mxu1 %v2164_v52 }
  0x8a   : > { %1296 = vmatprep.subr.bf16.mxu0 %v2161_v50 }
  0x8c   : > { %1143 = vmatpush1.bf16.msra.mxu1 %v2162_v54 }
  0x8d   : > { %1297 = vmatpush1.bf16.msra.mxu0 %v2159_v53  ;;  %1144 = vmatprep.subr.bf16.mxu1 %v2170_v56 }
  0x8e   : > { %1298 = vmatprep.subr.bf16.mxu0 %v2167_v55 }
  0x90   : > { %1145 = vmatpush1.bf16.msra.mxu1 %v2168_v58 }
  0x91   : > { %1299 = vmatpush1.bf16.msra.mxu0 %v2165_v57  ;;  %1146 = vmatprep.subr.bf16.mxu1 %v2176_v60 }
  0x92   : > { %1300 = vmatprep.subr.bf16.mxu0 %v2173_v59 }
  0x94   : > { %1147 = vmatpush1.bf16.msra.mxu1 %v2174_v51 }
  0x95   : > { %1301 = vmatpush1.bf16.msra.mxu0 %v2171_v61  ;;  %1148 = vmatprep.subr.bf16.mxu1 %v2182_v63 }
  0x96   : > { %1302 = vmatprep.subr.bf16.mxu0 %v2179_v62 }
  0x98   : > { %1149 = vmatpush1.bf16.msra.mxu1 %v2180_v2 }
  0x99   : > { %1303 = vmatpush1.bf16.msra.mxu0 %v2177_v1  ;;  %1150 = vmatprep.subr.bf16.mxu1 %v2185_v3 }
  0x9a   : > { %1345 = vmatprep.subr.bf16.mxu0 %v2188_v4 }
  0x9c   : > { %1305 = vmatmul.mubr.bf16.vlgmr.msra.gmra.mrb[32].mxu0 %v2366_v8  ;;  %1151 = vmatpush1.bf16.msra.mxu1 %v2183_v5 }
  0x9d   : > { %1346 = vmatpush1.bf16.msra.mxu0 %v2186_v6  ;;  %1152 = vmatprep.subr.bf16.mxu1 %v2191_v7 }
  0x9e   : > { %1314 = vmatprep.mubr.bf16.mxu0 %v2369_v13  ;;  %1347 = vmatprep.subr.bf16.mxu0 %v2197_v9 }
  0xa0   : > { %1153 = vmatpush1.bf16.msra.mxu1 %v2189_v11 }
  0xa1   : > { %1348 = vmatpush1.bf16.msra.mxu0 %v2195_v12  ;;  %1154 = vmatprep.subr.bf16.mxu1 %v2194_v14 }
  0xa2   : > { %1349 = vmatprep.subr.bf16.mxu0 %v2203_v16 }
  0xa4   : > { %1315 = vmatmul.mubr.bf16.gmra.mrb[36].mxu0 %v2377_v19  ;;  %1155 = vmatpush1.bf16.msra.mxu1 %v2192_v18 }
  0xa5   : > { %1324 = vmatprep.mubr.bf16.mxu0 %v2380_v25  ;;  %1156 = vmatprep.subr.bf16.mxu1 %v2200_v20 }
  0xa6   : > { %1350 = vmatpush1.bf16.msra.mxu0 %v2201_v21 }
  0xa7   : > { %1351 = vmatprep.subr.bf16.mxu0 %v978_v24 }
  0xa8   : > { %1157 = vmatpush1.bf16.msra.mxu1 %v2198_v26 }
  0xa9   : > { %1933 = vmatprep.subr.bf16.mxu1 %v2188_v4 }
  0xaa   : > { %1352 = vmatpush1.bf16.msra.mxu0 %v975_v27 }
  0xab   : > { %1159 = vmatmul.mubr.bf16.vlgmr.msra.gmra.mrb[16].mxu1 %v2366_v8 }
  0xac   : > { %1325 = vmatmul.mubr.bf16.gmra.mrb[40].mxu0 %v2388_v30  ;;  %1937 = vmatpush1.bf16.msra.mxu1 %v2186_v6 }
  0xad   : > { %1334 = vmatprep.mubr.bf16.mxu0 %v2391_v36  ;;  %1168 = vmatprep.mubr.bf16.mxu1 %v2369_v13 }
  0xae   : > { %1934 = vmatprep.subr.bf16.mxu1 %v2197_v9 }
  0xb0   : > { %1938 = vmatpush1.bf16.msra.mxu1 %v2195_v12 }
  0xb1   : > { %1935 = vmatprep.subr.bf16.mxu1 %v2203_v16 }
  0xb3   : > { %1169 = vmatmul.mubr.bf16.gmra.mrb[20].mxu1 %v2377_v19 }
  0xb4   : > { %1335 = vmatmul.mubr.bf16.gmra.mrb[44].mxu0 %v2396_v41  ;;  %1178 = vmatprep.mubr.bf16.mxu1 %v2380_v25 }
  0xb5   : > { %1377 = vmatprep.mubr.bf16.mxu0 %v2249_v0  ;;  %1939 = vmatpush1.bf16.msra.mxu1 %v2201_v21 }
  0xb6   : > { %1936 = vmatprep.subr.bf16.mxu1 %v978_v24 }
  0xb9   : > { %1940 = vmatpush1.bf16.msra.mxu1 %v975_v27 }
  0xbb   : > { %1179 = vmatmul.mubr.bf16.gmra.mrb[24].mxu1 %v2388_v30 }
  0xbc   : > { %1927 = vmatmul.mubr.msk.bf16.vlgmr.msra.gmra.mrb[32].mxu0 %vm946_vm1, %v2330_v23  ;;  %1188 = vmatprep.mubr.bf16.mxu1 %v2391_v36 }
  0xbd   : > { %1387 = vmatprep.mubr.bf16.mxu0 %v2249_v0 }
  0xc3   : > { %1189 = vmatmul.mubr.bf16.gmra.mrb[28].mxu1 %v2396_v41 }
  0xc4   : > { %1928 = vmatmul.mubr.msk.bf16.gmra.mrb[36].mxu0 %vm946_vm1, %v2336_v31  ;;  %1407 = vmatprep.mubr.bf16.mxu1 %v2249_v0 }
  0xc5   : > { %1397 = vmatprep.mubr.bf16.mxu0 %v2249_v0 }
  0xcb   : > { %1930 = vmatmul.mubr.msk.bf16.vlgmr.msra.gmra.mrb[32].mxu1 %vm946_vm1, %v2350_v49 }
  0xcc   : > { %1929 = vmatmul.mubr.msk.bf16.gmra.mrb[40].mxu0 %vm946_vm1, %v2344_v44 }
 0x10f   : > { %v1087_v15 = vpop.f32.mrb[0].mxu0 }
 0x110   : > { %v1089_v23 = vpop.f32.mrb[1].mxu0 }
 0x111   : > { %v1091_v8 = vpop.f32.mrb[2].mxu0 }
 0x112   : > { %v1093_v13 = vpop.f32.mrb[3].mxu0 }
 0x117   : > { %v1097_v19 = vpop.f32.mrb[4].mxu0 }
 0x118   : > { %v1099_v25 = vpop.f32.mrb[5].mxu0 }
 0x119   : > { %v1101_v28 = vpop.f32.mrb[6].mxu0 }
 0x11a   : > { %v1103_v31 = vpop.f32.mrb[7].mxu0 }
 0x11f   : > { %v2428_v29 = vpop.f32.mrb[8].mxu0 }
 0x120   : > { %v2430_v30 = vpop.f32.mrb[9].mxu0 }
 0x121   : > { %v2432_v32 = vpop.f32.mrb[10].mxu0 }
 0x122   : > { %v2434_v0 = vpop.f32.mrb[11].mxu0 }
 0x127   : > { %v2436_v44 = vpop.f32.mrb[12].mxu0 }
 0x128   : > { %v2438_v33 = vpop.f32.mrb[13].mxu0 }
 0x129   : > { %v2440_v49 = vpop.f32.mrb[14].mxu0 }
 0x12a   : > { %v2442_v34 = vpop.f32.mrb[15].mxu0 }
 0x12f   : > { %v2444_v35 = vpop.f32.mrb[16].mxu0 }
 0x130   : > { %v2446_v36 = vpop.f32.mrb[17].mxu0 }
 0x131   : > { %v2448_v37 = vpop.f32.mrb[18].mxu0 }
 0x132   : > { %v2450_v38 = vpop.f32.mrb[19].mxu0 }
 0x137   : > { %v2452_v39 = vpop.f32.mrb[20].mxu0 }
 0x138   : > { %v2454_v40 = vpop.f32.mrb[21].mxu0 }
 0x139   : > { %v2456_v41 = vpop.f32.mrb[22].mxu0 }
 0x13a   : > { %v2458_v42 = vpop.f32.mrb[23].mxu0 }
 0x13e   : > { %v1014_v43 = vpop.f32.mrb[0].mxu1 }
 0x13f   : > { %v2460_v45 = vpop.f32.mrb[24].mxu0  ;;  %v1088_v46 = vadd.f32 %v1087_v15, %v1014_v43  ;;  %v1016_v47 = vpop.f32.mrb[1].mxu1 }
 0x140   : > { %v2462_v48 = vpop.f32.mrb[25].mxu0  ;;  %v1090_v50 = vadd.f32 %v1089_v23, %v1016_v47  ;;  %v1018_v52 = vpop.f32.mrb[2].mxu1 }
 0x141   : > { %v2464_v53 = vpop.f32.mrb[26].mxu0  ;;  %v1418_v54 = vmul.f32 -1.5, %v1088_v46  ;;  %v1092_v55 = vadd.f32 %v1091_v8, %v1018_v52  ;;  %v1020_v56 = vpop.f32.mrb[3].mxu1 }
 0x142   : > { %v2466_v57 = vpop.f32.mrb[27].mxu0  ;;  %v1419_v58 = vmul.f32 -1.5, %v1090_v50  ;;  %v1094_v59 = vadd.f32 %v1093_v13, %v1020_v56 }
 0x143   : > { %v1466_v60 = vmax.f32 %v1088_v46, %v1418_v54  ;;  %v1424_v61 = vmul.f32 -1.5, %v1092_v55 }
 0x144   : > { %v1467_v51 = vmax.f32 %v1090_v50, %v1419_v58  ;;  %v1425_v62 = vmul.f32 -1.5, %v1094_v59 }
 0x145   : > { %v1514_v63 = vmul.f32 0.16666667, %v1466_v60  ;;  %v1472_v1 = vmax.f32 %v1092_v55, %v1424_v61 }
 0x146   : > { %v1515_v2 = vmul.f32 0.16666667, %v1467_v51  ;;  %v1473_v3 = vmax.f32 %v1094_v59, %v1425_v62  ;;  %v1024_v4 = vpop.f32.mrb[4].mxu1 }
 0x147   : > { %v2469_v5 = vpop.f32.mrb[28].mxu0  ;;  %v1562_v6 = vadd.f32 0.5, %v1514_v63  ;;  %v1520_v7 = vmul.f32 0.16666667, %v1472_v1  ;;  %v1098_v9 = vadd.f32 %v1097_v19, %v1024_v4  ;;  %v1026_v10 = vpop.f32.mrb[5].mxu1 }
 0x148   : > { %v2471_v11 = vpop.f32.mrb[29].mxu0  ;;  %v1563_v12 = vadd.f32 0.5, %v1515_v2  ;;  %v1521_v14 = vmul.f32 0.16666667, %v1473_v3  ;;  %v1100_v16 = vadd.f32 %v1099_v25, %v1026_v10  ;;  %v1028_v17 = vpop.f32.mrb[6].mxu1 }
 0x149   : > { %v2478_v18 = vpop.f32.mrb[30].mxu0  ;;  %v1610_v20 = vmin.f32 %v1562_v6, 1.0  ;;  %v1568_v21 = vadd.f32 0.5, %v1520_v7  ;;  %v1430_v22 = vmul.f32 -1.5, %v1098_v9  ;;  %v1102_v24 = vadd.f32 %v1101_v28, %v1028_v17  ;;  %v1030_v26 = vpop.f32.mrb[7].mxu1 }
 0x14a   : > { %v2480_v27 = vpop.f32.mrb[31].mxu0  ;;  %v1611_v15 = vmin.f32 %v1563_v12, 1.0  ;;  %v1569_v23 = vadd.f32 0.5, %v1521_v14  ;;  %v1431_v8 = vmul.f32 -1.5, %v1100_v16  ;;  %v1104_v13 = vadd.f32 %v1103_v31, %v1030_v26 }
 0x14b   : > { %1658 = vst [vmem:[%s2476_s8] sm:$0xff] %v1610_v20  ;;  %v1616_v19 = vmin.f32 %v1568_v21, 1.0  ;;  %v1478_v25 = vmax.f32 %v1098_v9, %v1430_v22  ;;  %v1436_v43 = vmul.f32 -1.5, %v1102_v24 }
 0x14c   : > { %1659 = vst [vmem:[%s2476_s8 + $0x8] sm:$0xff] %v1611_v15  ;;  %v1617_v46 = vmin.f32 %v1569_v23, 1.0  ;;  %v1479_v47 = vmax.f32 %v1100_v16, %v1431_v8  ;;  %v1437_v50 = vmul.f32 -1.5, %v1104_v13 }
 0x14d   : > { %1664 = vst [vmem:[%s2476_s8 + $0x30] sm:$0xff] %v1616_v19  ;;  %v1526_v52 = vmul.f32 0.16666667, %v1478_v25  ;;  %v1484_v54 = vmax.f32 %v1102_v24, %v1436_v43 }
 0x14e   : > { %1665 = vst [vmem:[%s2476_s8 + $0x38] sm:$0xff] %v1617_v46  ;;  %v1527_v28 = vmul.f32 0.16666667, %v1479_v47  ;;  %v1485_v55 = vmax.f32 %v1104_v13, %v1437_v50  ;;  %v1034_v56 = vpop.f32.mrb[8].mxu1 }
 0x14f   : > { %v1574_v58 = vadd.f32 0.5, %v1526_v52  ;;  %v1532_v59 = vmul.f32 0.16666667, %v1484_v54  ;;  %v1108_v31 = vadd.f32 %v2428_v29, %v1034_v56  ;;  %v1036_v60 = vpop.f32.mrb[9].mxu1 }
 0x150   : > { %v1575_v61 = vadd.f32 0.5, %v1527_v28  ;;  %v1533_v51 = vmul.f32 0.16666667, %v1485_v55  ;;  %v1110_v62 = vadd.f32 %v2430_v30, %v1036_v60  ;;  %v1038_v63 = vpop.f32.mrb[10].mxu1 }
 0x151   : > { %v1622_v1 = vmin.f32 %v1574_v58, 1.0  ;;  %v1580_v2 = vadd.f32 0.5, %v1532_v59  ;;  %v1442_v3 = vmul.f32 -1.5, %v1108_v31  ;;  %v1112_v4 = vadd.f32 %v2432_v32, %v1038_v63  ;;  %v1040_v6 = vpop.f32.mrb[11].mxu1 }
 0x152   : > { %v1623_v7 = vmin.f32 %v1575_v61, 1.0  ;;  %v1581_v9 = vadd.f32 0.5, %v1533_v51  ;;  %v1443_v10 = vmul.f32 -1.5, %v1110_v62  ;;  %v1114_v29 = vadd.f32 %v2434_v0, %v1040_v6 }
 0x153   : > { %1670 = vst [vmem:[%s2476_s8 + $0x60] sm:$0xff] %v1622_v1  ;;  %v1628_v12 = vmin.f32 %v1580_v2, 1.0  ;;  %v1490_v14 = vmax.f32 %v1108_v31, %v1442_v3  ;;  %v1448_v16 = vmul.f32 -1.5, %v1112_v4 }
 0x154   : > { %1671 = vst [vmem:[%s2476_s8 + $0x68] sm:$0xff] %v1623_v7  ;;  %v1629_v30 = vmin.f32 %v1581_v9, 1.0  ;;  %v1491_v17 = vmax.f32 %v1110_v62, %v1443_v10  ;;  %v1449_v20 = vmul.f32 -1.5, %v1114_v29 }
 0x155   : > { %1676 = vst [vmem:[%s2476_s8 + $0x90] sm:$0xff] %v1628_v12  ;;  %v1538_v21 = vmul.f32 0.16666667, %v1490_v14  ;;  %v1496_v22 = vmax.f32 %v1112_v4, %v1448_v16 }
 0x156   : > { %1677 = vst [vmem:[%s2476_s8 + $0x98] sm:$0xff] %v1629_v30  ;;  %v1539_v32 = vmul.f32 0.16666667, %v1491_v17  ;;  %v1497_v24 = vmax.f32 %v1114_v29, %v1449_v20  ;;  %v1044_v26 = vpop.f32.mrb[12].mxu1 }
 0x157   : > { %v1586_v15 = vadd.f32 0.5, %v1538_v21  ;;  %v1544_v23 = vmul.f32 0.16666667, %v1496_v22  ;;  %v1118_v0 = vadd.f32 %v2436_v44, %v1044_v26  ;;  %v1046_v8 = vpop.f32.mrb[13].mxu1 }
 0x158   : > { %v1587_v13 = vadd.f32 0.5, %v1539_v32  ;;  %v1545_v19 = vmul.f32 0.16666667, %v1497_v24  ;;  %v1120_v25 = vadd.f32 %v2438_v33, %v1046_v8  ;;  %v1048_v43 = vpop.f32.mrb[14].mxu1 }
 0x159   : > { %v1634_v46 = vmin.f32 %v1586_v15, 1.0  ;;  %v1592_v47 = vadd.f32 0.5, %v1544_v23  ;;  %v1454_v50 = vmul.f32 -1.5, %v1118_v0  ;;  %v1122_v52 = vadd.f32 %v2440_v49, %v1048_v43  ;;  %v1050_v54 = vpop.f32.mrb[15].mxu1 }
 0x15a   : > { %v1635_v28 = vmin.f32 %v1587_v13, 1.0  ;;  %v1593_v55 = vadd.f32 0.5, %v1545_v19  ;;  %v1455_v56 = vmul.f32 -1.5, %v1120_v25  ;;  %v1124_v44 = vadd.f32 %v2442_v34, %v1050_v54 }
 0x15b   : > { %1682 = vst [vmem:[%s2476_s8 + $0xc0] sm:$0xff] %v1634_v46  ;;  %v1640_v58 = vmin.f32 %v1592_v47, 1.0  ;;  %v1502_v59 = vmax.f32 %v1118_v0, %v1454_v50  ;;  %v1460_v31 = vmul.f32 -1.5, %v1122_v52 }
 0x15c   : > { %1683 = vst [vmem:[%s2476_s8 + $0xc8] sm:$0xff] %v1635_v28  ;;  %v1641_v33 = vmin.f32 %v1593_v55, 1.0  ;;  %v1503_v60 = vmax.f32 %v1120_v25, %v1455_v56  ;;  %v1461_v61 = vmul.f32 -1.5, %v1124_v44 }
 0x15d   : > { %1688 = vst [vmem:[%s2476_s8 + $0xf0] sm:$0xff] %v1640_v58  ;;  %v1550_v51 = vmul.f32 0.16666667, %v1502_v59  ;;  %v1508_v49 = vmax.f32 %v1122_v52, %v1460_v31 }
 0x15e   : > { %1689 = vst [vmem:[%s2476_s8 + $0xf8] sm:$0xff] %v1641_v33  ;;  %v1551_v62 = vmul.f32 0.16666667, %v1503_v60  ;;  %v1509_v63 = vmax.f32 %v1124_v44, %v1461_v61 }
 0x15f   : > { %v1598_v1 = vadd.f32 0.5, %v1550_v51  ;;  %v1556_v34 = vmul.f32 0.16666667, %v1508_v49 }
 0x160   : > { %v1599_v2 = vadd.f32 0.5, %v1551_v62  ;;  %v1557_v3 = vmul.f32 0.16666667, %v1509_v63 }
 0x161   : > { %v1646_v4 = vmin.f32 %v1598_v1, 1.0  ;;  %v1604_v6 = vadd.f32 0.5, %v1556_v34 }
 0x162   : > { %v1647_v7 = vmin.f32 %v1599_v2, 1.0  ;;  %v1605_v9 = vadd.f32 0.5, %v1557_v3 }
 0x163   : > { %1694 = vst [vmem:[%s2476_s8 + $0x120] sm:$0xff] %v1646_v4  ;;  %v1652_v10 = vmin.f32 %v1604_v6, 1.0 }
 0x164   : > { %1695 = vst [vmem:[%s2476_s8 + $0x128] sm:$0xff] %v1647_v7  ;;  %v1653_v29 = vmin.f32 %v1605_v9, 1.0 }
 0x165   : > { %1700 = vst [vmem:[%s2476_s8 + $0x150] sm:$0xff] %v1652_v10 }
 0x166   : > { %1701 = vst [vmem:[%s2476_s8 + $0x158] sm:$0xff] %v1653_v29 }
 0x17e   : > { %v1160_v12 = vpop.f32.mrb[16].mxu1 }
 0x17f   : > { %v1234_v14 = vadd.f32 %v2444_v35, %v1160_v12  ;;  %v1162_v16 = vpop.f32.mrb[17].mxu1 }
 0x180   : > { %v1236_v30 = vadd.f32 %v2446_v36, %v1162_v16  ;;  %v1164_v17 = vpop.f32.mrb[18].mxu1 }
 0x181   : > { %v1420_v20 = vmul.f32 -1.5, %v1234_v14  ;;  %v1238_v21 = vadd.f32 %v2448_v37, %v1164_v17  ;;  %v1166_v22 = vpop.f32.mrb[19].mxu1 }
 0x182   : > { %v1421_v32 = vmul.f32 -1.5, %v1236_v30  ;;  %v1240_v24 = vadd.f32 %v2450_v38, %v1166_v22 }
 0x183   : > { %v1468_v26 = vmax.f32 %v1234_v14, %v1420_v20  ;;  %v1426_v15 = vmul.f32 -1.5, %v1238_v21 }
 0x184   : > { %v1469_v23 = vmax.f32 %v1236_v30, %v1421_v32  ;;  %v1427_v0 = vmul.f32 -1.5, %v1240_v24 }
 0x185   : > { %v1516_v8 = vmul.f32 0.16666667, %v1468_v26  ;;  %v1474_v13 = vmax.f32 %v1238_v21, %v1426_v15 }
 0x186   : > { %v1517_v19 = vmul.f32 0.16666667, %v1469_v23  ;;  %v1475_v25 = vmax.f32 %v1240_v24, %v1427_v0  ;;  %v1170_v35 = vpop.f32.mrb[20].mxu1 }
 0x187   : > { %v2510_v43 = vpop.f32.mrb[44].mxu0  ;;  %v1564_v36 = vadd.f32 0.5, %v1516_v8  ;;  %v1522_v46 = vmul.f32 0.16666667, %v1474_v13  ;;  %v1244_v47 = vadd.f32 %v2452_v39, %v1170_v35  ;;  %v1172_v37 = vpop.f32.mrb[21].mxu1 }
 0x188   : > { %v2513_v50 = vpop.f32.mrb[45].mxu0  ;;  %v1565_v38 = vadd.f32 0.5, %v1517_v19  ;;  %v1523_v52 = vmul.f32 0.16666667, %v1475_v25  ;;  %v1246_v54 = vadd.f32 %v2454_v40, %v1172_v37  ;;  %v1174_v28 = vpop.f32.mrb[22].mxu1 }
 0x189   : > { %v2516_v55 = vpop.f32.mrb[46].mxu0  ;;  %v1612_v56 = vmin.f32 %v1564_v36, 1.0  ;;  %v1570_v44 = vadd.f32 0.5, %v1522_v46  ;;  %v1432_v58 = vmul.f32 -1.5, %v1244_v47  ;;  %v1248_v59 = vadd.f32 %v2456_v41, %v1174_v28  ;;  %v1176_v31 = vpop.f32.mrb[23].mxu1 }
 0x18a   : > { %v2519_v39 = vpop.f32.mrb[47].mxu0  ;;  %v1613_v33 = vmin.f32 %v1565_v38, 1.0  ;;  %v1571_v60 = vadd.f32 0.5, %v1523_v52  ;;  %v1433_v61 = vmul.f32 -1.5, %v1246_v54  ;;  %v1250_v51 = vadd.f32 %v2458_v42, %v1176_v31 }
 0x18b   : > { %1660 = vst [vmem:[%s2476_s8 + $0x10] sm:$0xff] %v1612_v56  ;;  %v1618_v40 = vmin.f32 %v1570_v44, 1.0  ;;  %v1480_v49 = vmax.f32 %v1244_v47, %v1432_v58  ;;  %v1438_v62 = vmul.f32 -1.5, %v1248_v59 }
 0x18c   : > { %1661 = vst [vmem:[%s2476_s8 + $0x18] sm:$0xff] %v1613_v33  ;;  %v1619_v63 = vmin.f32 %v1571_v60, 1.0  ;;  %v1481_v1 = vmax.f32 %v1246_v54, %v1433_v61  ;;  %v1439_v34 = vmul.f32 -1.5, %v1250_v51 }
 0x18d   : > { %1666 = vst [vmem:[%s2476_s8 + $0x40] sm:$0xff] %v1618_v40  ;;  %v1528_v2 = vmul.f32 0.16666667, %v1480_v49  ;;  %v1486_v41 = vmax.f32 %v1248_v59, %v1438_v62 }
 0x18e   : > { %1667 = vst [vmem:[%s2476_s8 + $0x48] sm:$0xff] %v1619_v63  ;;  %v1529_v3 = vmul.f32 0.16666667, %v1481_v1  ;;  %v1487_v4 = vmax.f32 %v1250_v51, %v1439_v34  ;;  %v1180_v7 = vpop.f32.mrb[24].mxu1 }
 0x18f   : > { %v1379_v6 = vpop.f32.mrb[32].mxu0  ;;  %v1576_v9 = vadd.f32 0.5, %v1528_v2  ;;  %v1534_v10 = vmul.f32 0.16666667, %v1486_v41  ;;  %v1254_v42 = vadd.f32 %v2460_v45, %v1180_v7  ;;  %v1182_v14 = vpop.f32.mrb[25].mxu1 }
 0x190   : > { %v1422_v29 = vmul.f32 -1.5, %v1379_v6  ;;  %v1381_v12 = vpop.f32.mrb[33].mxu0  ;;  %v1577_v16 = vadd.f32 0.5, %v1529_v3  ;;  %v1535_v30 = vmul.f32 0.16666667, %v1487_v4  ;;  %v1256_v20 = vadd.f32 %v2462_v48, %v1182_v14  ;;  %v1184_v22 = vpop.f32.mrb[26].mxu1 }
 0x191   : > { %v1423_v17 = vmul.f32 -1.5, %v1381_v12  ;;  %v1383_v21 = vpop.f32.mrb[34].mxu0  ;;  %v1624_v32 = vmin.f32 %v1576_v9, 1.0  ;;  %v1582_v24 = vadd.f32 0.5, %v1534_v10  ;;  %v1444_v15 = vmul.f32 -1.5, %v1254_v42  ;;  %v1186_v0 = vpop.f32.mrb[27].mxu1 }
 0x192   : > { %v1470_v26 = vmax.f32 %v1379_v6, %v1422_v29  ;;  %v1385_v23 = vpop.f32.mrb[35].mxu0  ;;  %v1625_v8 = vmin.f32 %v1577_v16, 1.0  ;;  %v1583_v45 = vadd.f32 0.5, %v1535_v30  ;;  %v1445_v19 = vmul.f32 -1.5, %v1256_v20 }
 0x193   : > { %v1471_v13 = vmax.f32 %v1381_v12, %v1423_v17  ;;  %1672 = vst [vmem:[%s2476_s8 + $0x70] sm:$0xff] %v1624_v32  ;;  %v1630_v25 = vmin.f32 %v1582_v24, 1.0  ;;  %v1492_v36 = vmax.f32 %v1254_v42, %v1444_v15  ;;  %v1428_v48 = vmul.f32 -1.5, %v1383_v21 }
 0x194   : > { %v1518_v35 = vmul.f32 0.16666667, %v1470_v26  ;;  %1673 = vst [vmem:[%s2476_s8 + $0x78] sm:$0xff] %v1625_v8  ;;  %v1631_v46 = vmin.f32 %v1583_v45, 1.0  ;;  %v1493_v37 = vmax.f32 %v1256_v20, %v1445_v19  ;;  %v1258_v38 = vadd.f32 %v2464_v53, %v1184_v22 }
 0x195   : > { %v1519_v47 = vmul.f32 0.16666667, %v1471_v13  ;;  %1678 = vst [vmem:[%s2476_s8 + $0xa0] sm:$0xff] %v1630_v25  ;;  %v1540_v54 = vmul.f32 0.16666667, %v1492_v36  ;;  %v1476_v28 = vmax.f32 %v1383_v21, %v1428_v48  ;;  %v1429_v56 = vmul.f32 -1.5, %v1385_v23 }
 0x196   : > { %v1566_v52 = vadd.f32 0.5, %v1518_v35  ;;  %1679 = vst [vmem:[%s2476_s8 + $0xa8] sm:$0xff] %v1631_v46  ;;  %v1541_v58 = vmul.f32 0.16666667, %v1493_v37  ;;  %v1450_v59 = vmul.f32 -1.5, %v1258_v38  ;;  %v1260_v31 = vadd.f32 %v2466_v57, %v1186_v0  ;;  %v1190_v60 = vpop.f32.mrb[28].mxu1 }
 0x197   : > { %v1567_v44 = vadd.f32 0.5, %v1519_v47  ;;  %v1389_v33 = vpop.f32.mrb[36].mxu0  ;;  %v1588_v51 = vadd.f32 0.5, %v1540_v54  ;;  %v1524_v40 = vmul.f32 0.16666667, %v1476_v28  ;;  %v1477_v49 = vmax.f32 %v1385_v23, %v1429_v56  ;;  %v1192_v62 = vpop.f32.mrb[29].mxu1 }
 0x198   : > { %v1614_v61 = vmin.f32 %v1566_v52, 1.0  ;;  %v1391_v53 = vpop.f32.mrb[37].mxu0  ;;  %v1589_v1 = vadd.f32 0.5, %v1541_v58  ;;  %v1498_v34 = vmax.f32 %v1258_v38, %v1450_v59  ;;  %v1451_v2 = vmul.f32 -1.5, %v1260_v31  ;;  %v1194_v3 = vpop.f32.mrb[30].mxu1 }
 0x199   : > { %v1615_v63 = vmin.f32 %v1567_v44, 1.0  ;;  %v1393_v41 = vpop.f32.mrb[38].mxu0  ;;  %v1636_v4 = vmin.f32 %v1588_v51, 1.0  ;;  %v1572_v57 = vadd.f32 0.5, %v1524_v40  ;;  %v1525_v6 = vmul.f32 0.16666667, %v1477_v49 }
 0x19a   : > { %1662 = vst [vmem:[%s2476_s8 + $0x20] sm:$0xff] %v1614_v61  ;;  %v1434_v7 = vmul.f32 -1.5, %v1389_v33  ;;  %v1395_v9 = vpop.f32.mrb[39].mxu0  ;;  %v1637_v10 = vmin.f32 %v1589_v1, 1.0  ;;  %v1546_v29 = vmul.f32 0.16666667, %v1498_v34  ;;  %v1499_v42 = vmax.f32 %v1260_v31, %v1451_v2 }
 0x19b   : > { %1663 = vst [vmem:[%s2476_s8 + $0x28] sm:$0xff] %v1615_v63  ;;  %v1264_v12 = vadd.f32 %v2469_v5, %v1190_v60  ;;  %v1196_v14 = vpop.f32.mrb[31].mxu1  ;;  %1684 = vst [vmem:[%s2476_s8 + $0xd0] sm:$0xff] %v1636_v4  ;;  %v1620_v16 = vmin.f32 %v1572_v57, 1.0  ;;  %v1573_v30 = vadd.f32 0.5, %v1525_v6  ;;  %v1435_v20 = vmul.f32 -1.5, %v1391_v53 }
 0x19c   : > { %v1482_v17 = vmax.f32 %v1389_v33, %v1434_v7  ;;  %1685 = vst [vmem:[%s2476_s8 + $0xd8] sm:$0xff] %v1637_v10  ;;  %v1594_v21 = vadd.f32 0.5, %v1546_v29  ;;  %v1547_v22 = vmul.f32 0.16666667, %v1499_v42  ;;  %v1266_v24 = vadd.f32 %v2471_v11, %v1192_v62 }
 0x19d   : > { %v1456_v32 = vmul.f32 -1.5, %v1264_v12  ;;  %1668 = vst [vmem:[%s2476_s8 + $0x50] sm:$0xff] %v1620_v16  ;;  %v1621_v26 = vmin.f32 %v1573_v30, 1.0  ;;  %v1483_v23 = vmax.f32 %v1391_v53, %v1435_v20  ;;  %v1440_v0 = vmul.f32 -1.5, %v1393_v41 }
 0x19e   : > { %v1530_v15 = vmul.f32 0.16666667, %v1482_v17  ;;  %v1642_v5 = vmin.f32 %v1594_v21, 1.0  ;;  %v1595_v8 = vadd.f32 0.5, %v1547_v22  ;;  %v1457_v13 = vmul.f32 -1.5, %v1266_v24  ;;  %v1409_v25 = vpop.f32.mrb[32].mxu1 }
 0x19f   : > { %v1504_v45 = vmax.f32 %v1264_v12, %v1456_v32  ;;  %v1399_v19 = vpop.f32.mrb[40].mxu0  ;;  %1669 = vst [vmem:[%s2476_s8 + $0x58] sm:$0xff] %v1621_v26  ;;  %v1531_v36 = vmul.f32 0.16666667, %v1483_v23  ;;  %v1488_v48 = vmax.f32 %v1393_v41, %v1440_v0  ;;  %v1268_v46 = vadd.f32 %v2478_v18, %v1194_v3  ;;  %v1411_v47 = vpop.f32.mrb[33].mxu1 }
 0x1a0   : > { %v1578_v35 = vadd.f32 0.5, %v1530_v15  ;;  %v1401_v11 = vpop.f32.mrb[41].mxu0  ;;  %1690 = vst [vmem:[%s2476_s8 + $0x100] sm:$0xff] %v1642_v5  ;;  %v1643_v37 = vmin.f32 %v1595_v8, 1.0  ;;  %v1505_v52 = vmax.f32 %v1266_v24, %v1457_v13  ;;  %v1441_v54 = vmul.f32 -1.5, %v1395_v9  ;;  %v1413_v56 = vpop.f32.mrb[34].mxu1 }
 0x1a1   : > { %v1552_v38 = vmul.f32 0.16666667, %v1504_v45  ;;  %v1403_v28 = vpop.f32.mrb[42].mxu0  ;;  %v1579_v58 = vadd.f32 0.5, %v1531_v36  ;;  %v1536_v59 = vmul.f32 0.16666667, %v1488_v48  ;;  %v1270_v51 = vadd.f32 %v2480_v27, %v1196_v14 }
 0x1a2   : > { %v1626_v44 = vmin.f32 %v1578_v35, 1.0  ;;  %v1462_v31 = vmul.f32 -1.5, %v1268_v46  ;;  %v1405_v33 = vpop.f32.mrb[43].mxu0  ;;  %1691 = vst [vmem:[%s2476_s8 + $0x108] sm:$0xff] %v1643_v37  ;;  %v1553_v61 = vmul.f32 0.16666667, %v1505_v52  ;;  %v1489_v18 = vmax.f32 %v1395_v9, %v1441_v54 }
 0x1a3   : > { %v1600_v60 = vadd.f32 0.5, %v1552_v38  ;;  %v1415_v40 = vpop.f32.mrb[35].mxu1  ;;  %v1627_v49 = vmin.f32 %v1579_v58, 1.0  ;;  %v1584_v53 = vadd.f32 0.5, %v1536_v59  ;;  %v1446_v63 = vmul.f32 -1.5, %v1399_v19 }
 0x1a4   : > { %1674 = vst [vmem:[%s2476_s8 + $0x80] sm:$0xff] %v1626_v44  ;;  %v1510_v62 = vmax.f32 %v1268_v46, %v1462_v31  ;;  %v1601_v34 = vadd.f32 0.5, %v1553_v61  ;;  %v1537_v2 = vmul.f32 0.16666667, %v1489_v18  ;;  %v1463_v41 = vmul.f32 -1.5, %v1270_v51 }
 0x1a5   : > { %v1648_v1 = vmin.f32 %v1600_v60, 1.0  ;;  %1675 = vst [vmem:[%s2476_s8 + $0x88] sm:$0xff] %v1627_v49  ;;  %v1632_v3 = vmin.f32 %v1584_v53, 1.0  ;;  %v1494_v57 = vmax.f32 %v1399_v19, %v1446_v63  ;;  %v1447_v6 = vmul.f32 -1.5, %v1401_v11 }
 0x1a6   : > { %v1558_v4 = vmul.f32 0.16666667, %v1510_v62  ;;  %v1649_v27 = vmin.f32 %v1601_v34, 1.0  ;;  %v1585_v7 = vadd.f32 0.5, %v1537_v2  ;;  %v1511_v9 = vmax.f32 %v1270_v51, %v1463_v41 }
 0x1a7   : > { %1696 = vst [vmem:[%s2476_s8 + $0x130] sm:$0xff] %v1648_v1  ;;  %v1410_v10 = vadd.f32 %v1409_v25, %v2510_v43  ;;  %1680 = vst [vmem:[%s2476_s8 + $0xb0] sm:$0xff] %v1632_v3  ;;  %v1542_v42 = vmul.f32 0.16666667, %v1494_v57  ;;  %v1495_v12 = vmax.f32 %v1401_v11, %v1447_v6  ;;  %v1452_v14 = vmul.f32 -1.5, %v1403_v28 }
 0x1a8   : > { %v1606_v29 = vadd.f32 0.5, %v1558_v4  ;;  %1697 = vst [vmem:[%s2476_s8 + $0x138] sm:$0xff] %v1649_v27  ;;  %v1633_v16 = vmin.f32 %v1585_v7, 1.0  ;;  %v1559_v30 = vmul.f32 0.16666667, %v1511_v9  ;;  %v1412_v20 = vadd.f32 %v1411_v47, %v2513_v50 }
 0x1a9   : > { %v1458_v17 = vmul.f32 -1.5, %v1410_v10  ;;  %v1590_v22 = vadd.f32 0.5, %v1542_v42  ;;  %v1543_v32 = vmul.f32 0.16666667, %v1495_v12  ;;  %v1500_v24 = vmax.f32 %v1403_v28, %v1452_v14 }
 0x1aa   : > { %v1654_v21 = vmin.f32 %v1606_v29, 1.0  ;;  %1681 = vst [vmem:[%s2476_s8 + $0xb8] sm:$0xff] %v1633_v16  ;;  %v1607_v26 = vadd.f32 0.5, %v1559_v30  ;;  %v1459_v15 = vmul.f32 -1.5, %v1412_v20  ;;  %v1453_v23 = vmul.f32 -1.5, %v1405_v33 }
 0x1ab   : > { %v1506_v43 = vmax.f32 %v1410_v10, %v1458_v17  ;;  %v1638_v0 = vmin.f32 %v1590_v22, 1.0  ;;  %v1591_v5 = vadd.f32 0.5, %v1543_v32  ;;  %v1548_v8 = vmul.f32 0.16666667, %v1500_v24 }
 0x1ac   : > { %1702 = vst [vmem:[%s2476_s8 + $0x160] sm:$0xff] %v1654_v21  ;;  %v1414_v45 = vadd.f32 %v1413_v56, %v2516_v55  ;;  %v1655_v13 = vmin.f32 %v1607_v26, 1.0  ;;  %v1507_v19 = vmax.f32 %v1412_v20, %v1459_v15  ;;  %v1501_v25 = vmax.f32 %v1405_v33, %v1453_v23 }
 0x1ad   : > { %v1554_v50 = vmul.f32 0.16666667, %v1506_v43  ;;  %1686 = vst [vmem:[%s2476_s8 + $0xe0] sm:$0xff] %v1638_v0  ;;  %v1639_v35 = vmin.f32 %v1591_v5, 1.0  ;;  %v1596_v36 = vadd.f32 0.5, %v1548_v8  ;;  %v1416_v46 = vadd.f32 %v1415_v40, %v2519_v39 }
 0x1ae   : > { %v1464_v48 = vmul.f32 -1.5, %v1414_v45  ;;  %1703 = vst [vmem:[%s2476_s8 + $0x168] sm:$0xff] %v1655_v13  ;;  %v1555_v47 = vmul.f32 0.16666667, %v1507_v19  ;;  %v1549_v37 = vmul.f32 0.16666667, %v1501_v25 }
 0x1af   : > { %v1602_v11 = vadd.f32 0.5, %v1554_v50  ;;  %1687 = vst [vmem:[%s2476_s8 + $0xe8] sm:$0xff] %v1639_v35  ;;  %v1644_v55 = vmin.f32 %v1596_v36, 1.0  ;;  %v1465_v52 = vmul.f32 -1.5, %v1416_v46 }
 0x1b0   : > { %v1512_v38 = vmax.f32 %v1414_v45, %v1464_v48  ;;  %v1603_v28 = vadd.f32 0.5, %v1555_v47  ;;  %v1597_v56 = vadd.f32 0.5, %v1549_v37 }
 0x1b1   : > { %v1650_v54 = vmin.f32 %v1602_v11, 1.0  ;;  %1692 = vst [vmem:[%s2476_s8 + $0x110] sm:$0xff] %v1644_v55  ;;  %v1513_v58 = vmax.f32 %v1416_v46, %v1465_v52 }
 0x1b2   : > { %v1560_v44 = vmul.f32 0.16666667, %v1512_v38  ;;  %v1651_v39 = vmin.f32 %v1603_v28, 1.0  ;;  %v1645_v59 = vmin.f32 %v1597_v56, 1.0 }
 0x1b3   : > { %1698 = vst [vmem:[%s2476_s8 + $0x140] sm:$0xff] %v1650_v54  ;;  %v1561_v33 = vmul.f32 0.16666667, %v1513_v58 }
 0x1b4   : > { %v1608_v31 = vadd.f32 0.5, %v1560_v44  ;;  %1699 = vst [vmem:[%s2476_s8 + $0x148] sm:$0xff] %v1651_v39  ;;  %1693 = vst [vmem:[%s2476_s8 + $0x118] sm:$0xff] %v1645_v59 }
 0x1b5   : > { %v1609_v61 = vadd.f32 0.5, %v1561_v33 }
 0x1b6   : > { %v1656_v60 = vmin.f32 %v1608_v31, 1.0 }
 0x1b7   : > { %v1657_v18 = vmin.f32 %v1609_v61, 1.0 }
 0x1b8   : > { %1704 = vst [vmem:[%s2476_s8 + $0x170] sm:$0xff] %v1656_v60 }
 0x1b9   : > { %1705 = vst [vmem:[%s2476_s8 + $0x178] sm:$0xff] %v1657_v18 }
 0x1ba PF: > { %s13_s9 = sadd.s32 1, %s2244_s9  }
 0x1bb   : > { %p10_p3 = scmp.ge.s32.totalorder %s13_s9, 4  }
 0x1bd   :  { %12 = sbr.rel (!%p10_p3) target bundleno = 1 (0x1), region = 63 }
 0x1c4   :  { %1730 = vsyncpa [#allocation3], 1 }
 0x1c5   :  { %1732 = vsyncpa [#allocation3 + $0x1], 1 }

</bundles_post_ra>
